<compile_context>
chip_gen: v5e
topology: v5e:2x2
jax: 0.10.0
libtpu: 0.0.40
codegen_flags: <defaults>
</compile_context>

<pallas_src>
import functools

import jax
import jax.numpy as jnp
from jax.experimental import pallas as pl
from jax.experimental.pallas import tpu as pltpu

_LANE = 128
_VMEM_LIMIT = 32 * 1024 * 1024  # safe scoped budget on v5e/v6e, headroom on v7x (64 MiB phys)


def _round_up(n, m):
    return ((n + m - 1) // m) * m


def _pad_to(x, shape):
    return jnp.pad(x, [(0, s - d) for d, s in zip(x.shape, shape)])


# ---------------------------------------------------------------------------
# Kernel 1: fused GIN layer
#   per (m, j):  k = sched[m, j]
#     xw_k   = x[k] @ W1'                                   (W1' has eval-BN folded in)
#     acc[m] += A[m, k] @ xw_k    (+ xw_k when k == m  ->  the (1+eps)*x self term, eps=0)
#   on last j:  out[m] = relu( relu(acc + b1') @ W2 + b2 )
#   All-zero off-diagonal A tiles are skipped (no DMA: repeated block index; no compute:
#   pl.when(j < nnz[m])).
# ---------------------------------------------------------------------------
def _gin_layer_kernel(sched_ref, nnz_ref, a_ref, x_ref, w1_ref, b1_ref, w2_ref,
                      b2_ref, o_ref, acc_ref):
    m = pl.program_id(0)
    j = pl.program_id(1)

    @pl.when(j == 0)
    def _():
        acc_ref[...] = jnp.zeros_like(acc_ref)

    @pl.when(j < nnz_ref[m])
    def _():
        xw = jnp.dot(
            x_ref[...], w1_ref[...], preferred_element_type=jnp.float32
        ).astype(jnp.bfloat16)
        acc_ref[...] += jnp.dot(a_ref[...], xw, preferred_element_type=jnp.float32)

        @pl.when(sched_ref[m, j] == m)
        def _():
            # GIN self term (1 + eps) * x_i with eps = 0, i.e. +I folded in-kernel.
            acc_ref[...] += xw.astype(jnp.float32)

    @pl.when(j == pl.num_programs(1) - 1)
    def _():
        h = jnp.maximum(acc_ref[...] + b1_ref[...], 0.0)
        h = jnp.dot(
            h.astype(w2_ref.dtype), w2_ref[...], preferred_element_type=jnp.float32
        ) + b2_ref[...]
        o_ref[...] = jnp.maximum(h, 0.0).astype(o_ref.dtype)


def _gin_layer(sched, nnz, a_bf, x, w1, b1, w2, b2, *, tile):
    np_ = a_bf.shape[0]
    fp = w1.shape[0]
    hp = w1.shape[1]
    t = tile
    mt = np_ // t
    return pl.pallas_call(
        _gin_layer_kernel,
        out_shape=jax.ShapeDtypeStruct((np_, hp), jnp.bfloat16),
        grid_spec=pltpu.PrefetchScalarGridSpec(
            num_scalar_prefetch=2,          # sched [mt, mt] int32, nnz [mt] int32 (SMEM)
            grid=(mt, mt),                  # (row tiles "parallel", K schedule last)
            in_specs=[
                pl.BlockSpec((t, t), lambda m, j, sched, nnz: (m, sched[m, j])),
                pl.BlockSpec((t, fp), lambda m, j, sched, nnz: (sched[m, j], 0)),
                pl.BlockSpec((fp, hp), lambda m, j, sched, nnz: (0, 0)),   # W1' resident
                pl.BlockSpec((1, hp), lambda m, j, sched, nnz: (0, 0)),    # b1' resident
                pl.BlockSpec((hp, hp), lambda m, j, sched, nnz: (0, 0)),   # W2 resident
                pl.BlockSpec((1, hp), lambda m, j, sched, nnz: (0, 0)),    # b2 resident
            ],
            out_specs=pl.BlockSpec((t, hp), lambda m, j, sched, nnz: (m, 0)),
            scratch_shapes=[pltpu.VMEM((t, hp), jnp.float32)],
        ),
        compiler_params=pltpu.CompilerParams(
            dimension_semantics=("parallel", "arbitrary"),
            vmem_limit_bytes=_VMEM_LIMIT,
        ),
        cost_estimate=pl.CostEstimate(
            # worst case (all tiles non-zero); the schedule only makes it cheaper
            flops=2 * np_ * np_ * hp + 2 * np_ * np_ * fp * hp // t + 2 * np_ * hp * hp,
            transcendentals=0,
            bytes_accessed=(2 * np_ * np_                 # A (bf16)
                            + 2 * np_ * np_ * fp // t     # x re-read per row tile
                            + 2 * (fp * hp + hp * hp)     # W1', W2
                            + 2 * np_ * hp + 8 * hp),     # out + biases
        ),
    )(sched, nnz, a_bf, x, w1, b1, w2, b2)


# ---------------------------------------------------------------------------
# Kernel 2: mean-pool reduction + head MLP + softmax (padded class lanes masked)
# ---------------------------------------------------------------------------
def _head_kernel(p_ref, x_ref, wf1_ref, bf1_ref, wf2_ref, bf2_ref, o_ref, g_acc,
                 *, num_classes):
    k = pl.program_id(0)

    @pl.when(k == 0)
    def _():
        g_acc[...] = jnp.zeros_like(g_acc)

    g_acc[...] += jnp.dot(
        p_ref[...], x_ref[...].astype(jnp.float32), preferred_element_type=jnp.float32
    )

    @pl.when(k == pl.num_programs(0) - 1)
    def _():
        g = g_acc[...].astype(wf1_ref.dtype)
        z = jnp.dot(g, wf1_ref[...], preferred_element_type=jnp.float32) + bf1_ref[...]
        z = jnp.maximum(z, 0.0)
        # TODO(synk): Dropout(p=0.5) here is eval-mode identity.
        z = jnp.dot(
            z.astype(wf2_ref.dtype), wf2_ref[...], preferred_element_type=jnp.float32
        ) + bf2_ref[...]
        # mask padded class lanes so the softmax is not diluted
        col = jax.lax.broadcasted_iota(jnp.int32, z.shape, 1)
        z = jnp.where(col < num_classes, z, -jnp.inf)
        z = z - jnp.max(z, axis=1, keepdims=True)
        e = jnp.exp(z)
        o_ref[...] = e / jnp.sum(e, axis=1, keepdims=True)   # exact normalization


def _pool_head(p, x, wf1, bf1, wf2, bf2, *, num_classes, tile):
    g, np_ = p.shape
    hp = wf1.shape[0]
    cp = wf2.shape[1]
    t = tile
    kern = functools.partial(_head_kernel, num_classes=num_classes)
    return pl.pallas_call(
        kern,
        out_shape=jax.ShapeDtypeStruct((g, cp), jnp.float32),
        grid_spec=pltpu.PrefetchScalarGridSpec(
            num_scalar_prefetch=0,
            grid=(np_ // t,),
            in_specs=[
                pl.BlockSpec((g, t), lambda k: (0, k)),
                pl.BlockSpec((t, hp), lambda k: (k, 0)),
                pl.BlockSpec((hp, hp), lambda k: (0, 0)),
                pl.BlockSpec((1, hp), lambda k: (0, 0)),
                pl.BlockSpec((hp, cp), lambda k: (0, 0)),
                pl.BlockSpec((1, cp), lambda k: (0, 0)),
            ],
            out_specs=pl.BlockSpec((g, cp), lambda k: (0, 0)),
            scratch_shapes=[pltpu.VMEM((g, hp), jnp.float32)],
        ),
        compiler_params=pltpu.CompilerParams(
            dimension_semantics=("arbitrary",),
            vmem_limit_bytes=_VMEM_LIMIT,
        ),
        cost_estimate=pl.CostEstimate(
            flops=2 * g * np_ * hp + 2 * g * hp * hp + 2 * g * hp * cp,
            transcendentals=g * cp,
            bytes_accessed=4 * g * np_ + 2 * np_ * hp + 2 * hp * (hp + cp) + 4 * g * cp,
        ),
    )(p, x, wf1, bf1, wf2, bf2)


# ---------------------------------------------------------------------------
# Full forward
# ---------------------------------------------------------------------------
def gin_classifier_forward(a, x, pool, layers, head, *, num_classes, tile=512):
    """a: [N,N] dense adjacency (A[dst,src]=multiplicity); x: [N,F]; pool: [G,N] mean-pool.

    layers/head: prepared (BN-folded, lane-padded, bf16) parameters from prepare_params."""
    assert tile % _LANE == 0
    n = a.shape[0]
    if n <= tile:
        t = _round_up(n, _LANE)
        np_ = t
    else:
        t = tile
        np_ = _round_up(n, t)
    mt = np_ // t

    fp0 = layers[0]["w1"].shape[0]      # layer-0 feature dim, already padded to 128 lanes
    a_bf = _pad_to(a, (np_, np_)).astype(jnp.bfloat16)    # exact for multiplicities <= 256
    h = _pad_to(x, (np_, fp0)).astype(jnp.bfloat16)
    p = _pad_to(pool, (pool.shape[0], np_)).astype(jnp.float32)

    # Block-nonzero schedule of A's (m, k) tiles (block-diagonal for batched graphs).
    # Diagonal tiles are always kept for the +I self term.  Padded entries repeat the last
    # non-zero tile index so their DMA is elided; compute is gated by j < nnz[m].
    tiles = (a_bf != 0).reshape(mt, t, mt, t).any(axis=(1, 3))
    tiles = tiles | jnp.eye(mt, dtype=bool)
    nnz = tiles.sum(axis=1).astype(jnp.int32)
    order = jnp.argsort(jnp.logical_not(tiles), axis=1).astype(jnp.int32)  # stable: nnz first
    last = jnp.take_along_axis(order, jnp.maximum(nnz - 1, 0)[:, None], axis=1)
    j_ids = jnp.arange(mt, dtype=jnp.int32)[None, :]
    sched = jnp.where(j_ids < nnz[:, None], order, last).astype(jnp.int32)

    for layer in layers:
        # (A + I) @ (x @ W1') + b1'   (W1' carries folded eval-BN; lane-dense H-wide output)
        h = _gin_layer(sched, nnz, a_bf, h,
                       layer["w1"], layer["b1"], layer["w2"], layer["b2"], tile=t)

    out = _pool_head(p, h, head["wf1"], head["bf1"], head["wf2"], head["bf2"],
                     num_classes=num_classes, tile=t)
    return out[:, :num_classes]


# ---------------------------------------------------------------------------
# Parameter construction / preparation (BN fold, lane padding, bf16 cast)
# ---------------------------------------------------------------------------
def make_params(key, f_in, hidden, num_classes, num_layers=2):
    """Module-style params: per-layer {w1,b1,BN stats,w2,b2} + head {wf1,bf1,wf2,bf2}."""
    layers = []
    in_c = f_in
    for _ in range(num_layers):
        key, k1, k2, k3, k4, k5, k6, k7, k8 = jax.random.split(key, 9)
        layers.append(dict(
            w1=jax.random.normal(k1, (in_c, hidden), jnp.float32) / jnp.sqrt(in_c),
            b1=0.1 * jax.random.normal(k2, (hidden,), jnp.float32),
            gamma=jax.random.uniform(k3, (hidden,), jnp.float32, 0.5, 1.5),
            beta=0.1 * jax.random.normal(k4, (hidden,), jnp.float32),
            mean=0.1 * jax.random.normal(k5, (hidden,), jnp.float32),
            var=jax.random.uniform(k6, (hidden,), jnp.float32, 0.5, 1.5),
            w2=jax.random.normal(k7, (hidden, hidden), jnp.float32) / jnp.sqrt(hidden),
            b2=0.1 * jax.random.normal(k8, (hidden,), jnp.float32),
        ))
        in_c = hidden
    key, k1, k2, k3, k4 = jax.random.split(key, 5)
    head = dict(
        wf1=jax.random.normal(k1, (hidden, hidden), jnp.float32) / jnp.sqrt(hidden),
        bf1=0.1 * jax.random.normal(k2, (hidden,), jnp.float32),
        wf2=jax.random.normal(k3, (hidden, num_classes), jnp.float32) / jnp.sqrt(hidden),
        bf2=0.1 * jax.random.normal(k4, (num_classes,), jnp.float32),
    )
    return layers, head


def prepare_params(layers, head, num_classes, bn_eps=1e-5):
    """Fold eval-mode BatchNorm into W1/b1, pad F_in/hidden/classes to 128 lanes, cast bf16."""
    hidden = layers[0]["w2"].shape[0]
    hp = _round_up(hidden, _LANE)
    cp = _round_up(num_classes, _LANE)

    prepped = []
    for li, layer in enumerate(layers):
        s = layer["gamma"] / jnp.sqrt(layer["var"] + bn_eps)
        tr = layer["beta"] - layer["mean"] * s
        w1 = layer["w1"] * s[None, :]
        b1 = layer["b1"] * s + tr
        in_pad = _round_up(w1.shape[0], _LANE) if li == 0 else hp
        prepped.append(dict(
            w1=_pad_to(w1, (in_pad, hp)).astype(jnp.bfloat16),
            b1=_pad_to(b1[None, :], (1, hp)).astype(jnp.float32),
            w2=_pad_to(layer["w2"], (hp, hp)).astype(jnp.bfloat16),
            b2=_pad_to(layer["b2"][None, :], (1, hp)).astype(jnp.float32),
        ))

    head_p = dict(
        wf1=_pad_to(head["wf1"], (hp, hp)).astype(jnp.bfloat16),
        bf1=_pad_to(head["bf1"][None, :], (1, hp)).astype(jnp.float32),
        wf2=_pad_to(head["wf2"], (hp, cp)).astype(jnp.bfloat16),
        bf2=_pad_to(head["bf2"][None, :], (1, cp)).astype(jnp.float32),
    )
    return prepped, head_p


def reference_forward(a, x, p, layers, head, *, num_classes):
    """Pure-JAX reference mirroring the kernel's dtype strategy (bf16 dots, f32 accumulation)."""
    a_bf = a.astype(jnp.bfloat16)
    fp0 = layers[0]["w1"].shape[0]
    h = jnp.pad(x, ((0, 0), (0, fp0 - x.shape[1]))).astype(jnp.bfloat16)
    for layer in layers:
        xw = jnp.dot(h, layer["w1"], preferred_element_type=jnp.float32).astype(jnp.bfloat16)
        agg = jnp.dot(a_bf, xw, preferred_element_type=jnp.float32) + xw.astype(jnp.float32)
        hmid = jnp.maximum(agg + layer["b1"], 0.0).astype(jnp.bfloat16)
        h = jnp.maximum(
            jnp.dot(hmid, layer["w2"], preferred_element_type=jnp.float32) + layer["b2"], 0.0
        ).astype(jnp.bfloat16)
    g = jnp.dot(p.astype(jnp.float32), h.astype(jnp.float32),
                preferred_element_type=jnp.float32)
    z = jnp.dot(g.astype(jnp.bfloat16), head["wf1"],
                preferred_element_type=jnp.float32) + head["bf1"]
    z = jnp.maximum(z, 0.0)
    z = jnp.dot(z.astype(jnp.bfloat16), head["wf2"],
                preferred_element_type=jnp.float32) + head["bf2"]
    return jax.nn.softmax(z[:, :num_classes], axis=1)


if __name__ == "__main__":
    # small synthetic graph batch: 2 graphs, 8 nodes each
    N, F_IN, HIDDEN, NUM_CLASSES, G, NUM_LAYERS = 16, 8, 32, 2, 2, 2
    key = jax.random.PRNGKey(0)

    key, kx, ke = jax.random.split(key, 3)
    x = jax.random.normal(kx, (N, F_IN), jnp.float32)
    batch = jnp.concatenate([jnp.zeros(8, jnp.int32), jnp.ones(8, jnp.int32)])

    # random intra-graph edges (both directions), as dense adjacency A[dst, src]
    e_per_graph = 12
    srcs, dsts = [], []
    for g in range(G):
        ke, k_src, k_dst = jax.random.split(ke, 3)
        s = jax.random.randint(k_src, (e_per_graph,), 0, 8) + g * 8
        d = jax.random.randint(k_dst, (e_per_graph,), 0, 8) + g * 8
        srcs += [s, d]
        dsts += [d, s]
    src = jnp.concatenate(srcs)
    dst = jnp.concatenate(dsts)
    A = jnp.zeros((N, N), jnp.float32).at[dst, src].add(1.0)

    # global_mean_pool as a dense [G, N] matrix with rows normalized by graph size
    onehot = (batch[None, :] == jnp.arange(G)[:, None]).astype(jnp.float32)
    P = onehot / jnp.sum(onehot, axis=1, keepdims=True)

    layers_raw, head_raw = make_params(key, F_IN, HIDDEN, NUM_CLASSES, NUM_LAYERS)
    layers_p, head_p = prepare_params(layers_raw, head_raw, NUM_CLASSES)

    fwd = jax.jit(gin_classifier_forward, static_argnames=("num_classes", "tile"))
    out = fwd(A, x, P, layers_p, head_p, num_classes=NUM_CLASSES, tile=512)
    out = jax.block_until_ready(out)

    ref = reference_forward(A, x, P, layers_p, head_p, num_classes=NUM_CLASSES)

    assert out.shape == (G, NUM_CLASSES)
    assert bool(jnp.all(jnp.isfinite(out)))
    assert bool(jnp.all(jnp.abs(jnp.sum(out, axis=1) - 1.0) < 1e-3))
    assert bool(jnp.allclose(out, ref, atol=1e-2)), (out, ref)
    print("KERNEL_OK")
</pallas_src>

<mosaic_0001>
module attributes {stable_mosaic.version = 11 : i64} {
  func.func @_gin_layer_kernel(%arg0: i32, %arg1: i32, %arg2: memref<1x1xi32, #tpu.memory_space<smem>>, %arg3: memref<1xi32, #tpu.memory_space<smem>>, %arg4: memref<128x128xbf16, #tpu.memory_space<vmem>>, %arg5: memref<128x128xbf16, #tpu.memory_space<vmem>>, %arg6: memref<128x128xbf16, #tpu.memory_space<vmem>>, %arg7: memref<1x128xf32, #tpu.memory_space<vmem>>, %arg8: memref<128x128xbf16, #tpu.memory_space<vmem>>, %arg9: memref<1x128xf32, #tpu.memory_space<vmem>>, %arg10: memref<128x128xbf16, #tpu.memory_space<vmem>>, %arg11: memref<128x128xf32, #tpu.memory_space<vmem>>) attributes {dimension_semantics = [#tpu.dimension_semantics<parallel>, #tpu.dimension_semantics<arbitrary>], iteration_bounds = array<i64: 1, 1>, scalar_prefetch = 2 : i64, scratch_operands = 1 : i64, tpu.core_type = #tpu.core_type<tc>, window_params = [{transform_indices = @transform_0, window_bounds = array<i64: 128, 128>}, {transform_indices = @transform_1, window_bounds = array<i64: 128, 128>}, {pipeline_mode = #tpu.pipeline_mode<synchronous>, transform_indices = @transform_2, window_bounds = array<i64: 128, 128>}, {pipeline_mode = #tpu.pipeline_mode<synchronous>, transform_indices = @transform_3, window_bounds = array<i64: 1, 128>}, {pipeline_mode = #tpu.pipeline_mode<synchronous>, transform_indices = @transform_4, window_bounds = array<i64: 128, 128>}, {pipeline_mode = #tpu.pipeline_mode<synchronous>, transform_indices = @transform_5, window_bounds = array<i64: 1, 128>}, {transform_indices = @transform_6, window_bounds = array<i64: 128, 128>}]} {
    %c0_i32 = arith.constant 0 : i32
    %0 = arith.cmpi eq, %arg1, %c0_i32 : i32
    %1 = arith.extui %0 : i1 to i32
    %c0_i32_0 = arith.constant 0 : i32
    %2 = arith.cmpi ne, %1, %c0_i32_0 : i32
    scf.if %2 {
      %cst = arith.constant 0.000000e+00 : f32
      %11 = vector.broadcast %cst : f32 to vector<128x128xf32>
      %c0 = arith.constant 0 : index
      %c0_4 = arith.constant 0 : index
      %12 = vector.load %arg11[%c0, %c0_4] : memref<128x128xf32, #tpu.memory_space<vmem>>, vector<128x128xf32>
      tpu.vector_store %arg11[%c0, %c0_4], %11 {strides = array<i32>} : memref<128x128xf32, #tpu.memory_space<vmem>>, vector<128x128xf32>,
    } else {
    }
    %3 = arith.index_cast %arg0 : i32 to index
    %4 = memref.load %arg3[%3] : memref<1xi32, #tpu.memory_space<smem>>
    %5 = arith.cmpi slt, %arg1, %4 : i32
    %6 = arith.extui %5 : i1 to i32
    %c0_i32_1 = arith.constant 0 : i32
    %7 = arith.cmpi ne, %6, %c0_i32_1 : i32
    scf.if %7 {
      %c0 = arith.constant 0 : index
      %c0_4 = arith.constant 0 : index
      %11 = vector.load %arg5[%c0, %c0_4] : memref<128x128xbf16, #tpu.memory_space<vmem>>, vector<128x128xbf16>
      %c0_5 = arith.constant 0 : index
      %c0_6 = arith.constant 0 : index
      %12 = vector.load %arg6[%c0_5, %c0_6] : memref<128x128xbf16, #tpu.memory_space<vmem>>, vector<128x128xbf16>
      %cst = arith.constant dense<0.000000e+00> : vector<128x128xf32>
      %13 = tpu.matmul %11, %12, %cst {dimension_numbers = #tpu.dot_dimension_numbers<[1], [0], [0], [1], [0, 0, 1, 1], [], []>} : vector<128x128xbf16>, vector<128x128xbf16>, vector<128x128xf32> -> vector<128x128xf32>
      %14 = arith.truncf %13 : vector<128x128xf32> to vector<128x128xbf16>
      %c0_7 = arith.constant 0 : index
      %c0_8 = arith.constant 0 : index
      %15 = vector.load %arg11[%c0_7, %c0_8] : memref<128x128xf32, #tpu.memory_space<vmem>>, vector<128x128xf32>
      %c0_9 = arith.constant 0 : index
      %c0_10 = arith.constant 0 : index
      %16 = vector.load %arg4[%c0_9, %c0_10] : memref<128x128xbf16, #tpu.memory_space<vmem>>, vector<128x128xbf16>
      %cst_11 = arith.constant dense<0.000000e+00> : vector<128x128xf32>
      %17 = tpu.matmul %16, %14, %cst_11 {dimension_numbers = #tpu.dot_dimension_numbers<[1], [0], [0], [1], [0, 0, 1, 1], [], []>} : vector<128x128xbf16>, vector<128x128xbf16>, vector<128x128xf32> -> vector<128x128xf32>
      %18 = arith.addf %15, %17 : vector<128x128xf32>
      %c0_12 = arith.constant 0 : index
      %c0_13 = arith.constant 0 : index
      %19 = vector.load %arg11[%c0_12, %c0_13] : memref<128x128xf32, #tpu.memory_space<vmem>>, vector<128x128xf32>
      tpu.vector_store %arg11[%c0_12, %c0_13], %18 {strides = array<i32>} : memref<128x128xf32, #tpu.memory_space<vmem>>, vector<128x128xf32>,
      %20 = arith.index_cast %arg0 : i32 to index
      %21 = arith.index_cast %arg1 : i32 to index
      %22 = memref.load %arg2[%20, %21] : memref<1x1xi32, #tpu.memory_space<smem>>
      %23 = arith.cmpi eq, %22, %arg0 : i32
      %24 = arith.extui %23 : i1 to i32
      %c0_i32_14 = arith.constant 0 : i32
      %25 = arith.cmpi ne, %24, %c0_i32_14 : i32
      scf.if %25 {
        %c0_15 = arith.constant 0 : index
        %c0_16 = arith.constant 0 : index
        %26 = vector.load %arg11[%c0_15, %c0_16] : memref<128x128xf32, #tpu.memory_space<vmem>>, vector<128x128xf32>
        %27 = arith.extf %14 : vector<128x128xbf16> to vector<128x128xf32>
        %28 = arith.addf %26, %27 : vector<128x128xf32>
        %c0_17 = arith.constant 0 : index
        %c0_18 = arith.constant 0 : index
        %29 = vector.load %arg11[%c0_17, %c0_18] : memref<128x128xf32, #tpu.memory_space<vmem>>, vector<128x128xf32>
        tpu.vector_store %arg11[%c0_17, %c0_18], %28 {strides = array<i32>} : memref<128x128xf32, #tpu.memory_space<vmem>>, vector<128x128xf32>,
      } else {
      }
    } else {
    }
    %c0_i32_2 = arith.constant 0 : i32
    %8 = arith.cmpi eq, %arg1, %c0_i32_2 : i32
    %9 = arith.extui %8 : i1 to i32
    %c0_i32_3 = arith.constant 0 : i32
    %10 = arith.cmpi ne, %9, %c0_i32_3 : i32
    scf.if %10 {
      %c0 = arith.constant 0 : index
      %c0_4 = arith.constant 0 : index
      %11 = vector.load %arg11[%c0, %c0_4] : memref<128x128xf32, #tpu.memory_space<vmem>>, vector<128x128xf32>
      %c0_5 = arith.constant 0 : index
      %c0_6 = arith.constant 0 : index
      %12 = vector.load %arg7[%c0_5, %c0_6] : memref<1x128xf32, #tpu.memory_space<vmem>>, vector<1x128xf32>
      %13 = vector.broadcast %12 : vector<1x128xf32> to vector<128x128xf32>
      %14 = arith.addf %11, %13 : vector<128x128xf32>
      %cst = arith.constant 0.000000e+00 : f32
      %15 = vector.broadcast %cst : f32 to vector<128x128xf32>
      %16 = arith.maximumf %14, %15 : vector<128x128xf32>
      %17 = arith.truncf %16 : vector<128x128xf32> to vector<128x128xbf16>
      %c0_7 = arith.constant 0 : index
      %c0_8 = arith.constant 0 : index
      %18 = vector.load %arg8[%c0_7, %c0_8] : memref<128x128xbf16, #tpu.memory_space<vmem>>, vector<128x128xbf16>
      %cst_9 = arith.constant dense<0.000000e+00> : vector<128x128xf32>
      %19 = tpu.matmul %17, %18, %cst_9 {dimension_numbers = #tpu.dot_dimension_numbers<[1], [0], [0], [1], [0, 0, 1, 1], [], []>} : vector<128x128xbf16>, vector<128x128xbf16>, vector<128x128xf32> -> vector<128x128xf32>
      %c0_10 = arith.constant 0 : index
      %c0_11 = arith.constant 0 : index
      %20 = vector.load %arg9[%c0_10, %c0_11] : memref<1x128xf32, #tpu.memory_space<vmem>>, vector<1x128xf32>
      %21 = vector.broadcast %20 : vector<1x128xf32> to vector<128x128xf32>
      %22 = arith.addf %19, %21 : vector<128x128xf32>
      %cst_12 = arith.constant 0.000000e+00 : f32
      %23 = vector.broadcast %cst_12 : f32 to vector<128x128xf32>
      %24 = arith.maximumf %22, %23 : vector<128x128xf32>
      %25 = arith.truncf %24 : vector<128x128xf32> to vector<128x128xbf16>
      %c0_13 = arith.constant 0 : index
      %c0_14 = arith.constant 0 : index
      %26 = vector.load %arg10[%c0_13, %c0_14] : memref<128x128xbf16, #tpu.memory_space<vmem>>, vector<128x128xbf16>
      tpu.vector_store %arg10[%c0_13, %c0_14], %25 {strides = array<i32>} : memref<128x128xbf16, #tpu.memory_space<vmem>>, vector<128x128xbf16>,
    } else {
    }
    return
  }
  func.func @transform_0(%arg0: i32, %arg1: i32, %arg2: memref<1x1xi32, #tpu.memory_space<smem>>, %arg3: memref<1xi32, #tpu.memory_space<smem>>) -> (i32, i32) {
    %0 = arith.index_cast %arg0 : i32 to index
    %1 = arith.index_cast %arg1 : i32 to index
    %2 = memref.load %arg2[%0, %1] : memref<1x1xi32, #tpu.memory_space<smem>>
    %c0_i32 = arith.constant 0 : i32
    return %arg0, %2 : i32, i32
  }
  func.func @transform_1(%arg0: i32, %arg1: i32, %arg2: memref<1x1xi32, #tpu.memory_space<smem>>, %arg3: memref<1xi32, #tpu.memory_space<smem>>) -> (i32, i32) {
    %0 = arith.index_cast %arg0 : i32 to index
    %1 = arith.index_cast %arg1 : i32 to index
    %2 = memref.load %arg2[%0, %1] : memref<1x1xi32, #tpu.memory_space<smem>>
    %c0_i32 = arith.constant 0 : i32
    %c0_i32_0 = arith.constant 0 : i32
    return %2, %c0_i32 : i32, i32
  }
  func.func @transform_2(%arg0: i32, %arg1: i32, %arg2: memref<1x1xi32, #tpu.memory_space<smem>>, %arg3: memref<1xi32, #tpu.memory_space<smem>>) -> (i32, i32) {
    %c0_i32 = arith.constant 0 : i32
    %c0_i32_0 = arith.constant 0 : i32
    %c0_i32_1 = arith.constant 0 : i32
    return %c0_i32, %c0_i32_0 : i32, i32
  }
  func.func @transform_3(%arg0: i32, %arg1: i32, %arg2: memref<1x1xi32, #tpu.memory_space<smem>>, %arg3: memref<1xi32, #tpu.memory_space<smem>>) -> (i32, i32) {
    %c0_i32 = arith.constant 0 : i32
    %c0_i32_0 = arith.constant 0 : i32
    %c0_i32_1 = arith.constant 0 : i32
    return %c0_i32, %c0_i32_0 : i32, i32
  }
  func.func @transform_4(%arg0: i32, %arg1: i32, %arg2: memref<1x1xi32, #tpu.memory_space<smem>>, %arg3: memref<1xi32, #tpu.memory_space<smem>>) -> (i32, i32) {
    %c0_i32 = arith.constant 0 : i32
    %c0_i32_0 = arith.constant 0 : i32
    %c0_i32_1 = arith.constant 0 : i32
    return %c0_i32, %c0_i32_0 : i32, i32
  }
  func.func @transform_5(%arg0: i32, %arg1: i32, %arg2: memref<1x1xi32, #tpu.memory_space<smem>>, %arg3: memref<1xi32, #tpu.memory_space<smem>>) -> (i32, i32) {
    %c0_i32 = arith.constant 0 : i32
    %c0_i32_0 = arith.constant 0 : i32
    %c0_i32_1 = arith.constant 0 : i32
    return %c0_i32, %c0_i32_0 : i32, i32
  }
  func.func @transform_6(%arg0: i32, %arg1: i32, %arg2: memref<1x1xi32, #tpu.memory_space<smem>>, %arg3: memref<1xi32, #tpu.memory_space<smem>>) -> (i32, i32) {
    %c0_i32 = arith.constant 0 : i32
    %c0_i32_0 = arith.constant 0 : i32
    return %arg0, %c0_i32 : i32, i32
  }
}

module attributes {stable_mosaic.version = 11 : i64} {
  func.func @_head_kernel(%arg0: i32, %arg1: memref<2x128xf32, #tpu.memory_space<vmem>>, %arg2: memref<128x128xbf16, #tpu.memory_space<vmem>>, %arg3: memref<128x128xbf16, #tpu.memory_space<vmem>>, %arg4: memref<1x128xf32, #tpu.memory_space<vmem>>, %arg5: memref<128x128xbf16, #tpu.memory_space<vmem>>, %arg6: memref<1x128xf32, #tpu.memory_space<vmem>>, %arg7: memref<2x128xf32, #tpu.memory_space<vmem>>, %arg8: memref<2x128xf32, #tpu.memory_space<vmem>>) attributes {dimension_semantics = [#tpu.dimension_semantics<arbitrary>], iteration_bounds = array<i64: 1>, scalar_prefetch = 0 : i64, scratch_operands = 1 : i64, tpu.core_type = #tpu.core_type<tc>, window_params = [{transform_indices = @transform_0, window_bounds = array<i64: 2, 128>}, {transform_indices = @transform_1, window_bounds = array<i64: 128, 128>}, {pipeline_mode = #tpu.pipeline_mode<synchronous>, transform_indices = @transform_2, window_bounds = array<i64: 128, 128>}, {pipeline_mode = #tpu.pipeline_mode<synchronous>, transform_indices = @transform_3, window_bounds = array<i64: 1, 128>}, {pipeline_mode = #tpu.pipeline_mode<synchronous>, transform_indices = @transform_4, window_bounds = array<i64: 128, 128>}, {pipeline_mode = #tpu.pipeline_mode<synchronous>, transform_indices = @transform_5, window_bounds = array<i64: 1, 128>}, {pipeline_mode = #tpu.pipeline_mode<synchronous>, transform_indices = @transform_6, window_bounds = array<i64: 2, 128>}]} {
    %c0_i32 = arith.constant 0 : i32
    %0 = arith.cmpi eq, %arg0, %c0_i32 : i32
    %1 = arith.extui %0 : i1 to i32
    %c0_i32_0 = arith.constant 0 : i32
    %2 = arith.cmpi ne, %1, %c0_i32_0 : i32
    scf.if %2 {
      %cst_10 = arith.constant 0.000000e+00 : f32
      %13 = vector.broadcast %cst_10 : f32 to vector<2x128xf32>
      %c0_11 = arith.constant 0 : index
      %c0_12 = arith.constant 0 : index
      %14 = vector.load %arg8[%c0_11, %c0_12] : memref<2x128xf32, #tpu.memory_space<vmem>>, vector<2x128xf32>
      tpu.vector_store %arg8[%c0_11, %c0_12], %13 {strides = array<i32>} : memref<2x128xf32, #tpu.memory_space<vmem>>, vector<2x128xf32>,
    } else {
    }
    %c0 = arith.constant 0 : index
    %c0_1 = arith.constant 0 : index
    %3 = vector.load %arg8[%c0, %c0_1] : memref<2x128xf32, #tpu.memory_space<vmem>>, vector<2x128xf32>
    %c0_2 = arith.constant 0 : index
    %c0_3 = arith.constant 0 : index
    %4 = vector.load %arg1[%c0_2, %c0_3] : memref<2x128xf32, #tpu.memory_space<vmem>>, vector<2x128xf32>
    %c0_4 = arith.constant 0 : index
    %c0_5 = arith.constant 0 : index
    %5 = vector.load %arg2[%c0_4, %c0_5] : memref<128x128xbf16, #tpu.memory_space<vmem>>, vector<128x128xbf16>
    %6 = arith.extf %5 : vector<128x128xbf16> to vector<128x128xf32>
    %cst = arith.constant dense<0.000000e+00> : vector<2x128xf32>
    %7 = tpu.matmul %4, %6, %cst {dimension_numbers = #tpu.dot_dimension_numbers<[1], [0], [0], [1], [0, 0, 1, 1], [], []>} : vector<2x128xf32>, vector<128x128xf32>, vector<2x128xf32> -> vector<2x128xf32>
    %8 = arith.addf %3, %7 : vector<2x128xf32>
    %c0_6 = arith.constant 0 : index
    %c0_7 = arith.constant 0 : index
    %9 = vector.load %arg8[%c0_6, %c0_7] : memref<2x128xf32, #tpu.memory_space<vmem>>, vector<2x128xf32>
    tpu.vector_store %arg8[%c0_6, %c0_7], %8 {strides = array<i32>} : memref<2x128xf32, #tpu.memory_space<vmem>>, vector<2x128xf32>,
    %c0_i32_8 = arith.constant 0 : i32
    %10 = arith.cmpi eq, %arg0, %c0_i32_8 : i32
    %11 = arith.extui %10 : i1 to i32
    %c0_i32_9 = arith.constant 0 : i32
    %12 = arith.cmpi ne, %11, %c0_i32_9 : i32
    scf.if %12 {
      %c0_10 = arith.constant 0 : index
      %c0_11 = arith.constant 0 : index
      %13 = vector.load %arg8[%c0_10, %c0_11] : memref<2x128xf32, #tpu.memory_space<vmem>>, vector<2x128xf32>
      %14 = arith.truncf %13 : vector<2x128xf32> to vector<2x128xbf16>
      %c0_12 = arith.constant 0 : index
      %c0_13 = arith.constant 0 : index
      %15 = vector.load %arg3[%c0_12, %c0_13] : memref<128x128xbf16, #tpu.memory_space<vmem>>, vector<128x128xbf16>
      %cst_14 = arith.constant dense<0.000000e+00> : vector<2x128xf32>
      %16 = tpu.matmul %14, %15, %cst_14 {dimension_numbers = #tpu.dot_dimension_numbers<[1], [0], [0], [1], [0, 0, 1, 1], [], []>} : vector<2x128xbf16>, vector<128x128xbf16>, vector<2x128xf32> -> vector<2x128xf32>
      %c0_15 = arith.constant 0 : index
      %c0_16 = arith.constant 0 : index
      %17 = vector.load %arg4[%c0_15, %c0_16] : memref<1x128xf32, #tpu.memory_space<vmem>>, vector<1x128xf32>
      %18 = vector.broadcast %17 : vector<1x128xf32> to vector<2x128xf32>
      %19 = arith.addf %16, %18 : vector<2x128xf32>
      %cst_17 = arith.constant 0.000000e+00 : f32
      %20 = vector.broadcast %cst_17 : f32 to vector<2x128xf32>
      %21 = arith.maximumf %19, %20 : vector<2x128xf32>
      %22 = arith.truncf %21 : vector<2x128xf32> to vector<2x128xbf16>
      %c0_18 = arith.constant 0 : index
      %c0_19 = arith.constant 0 : index
      %23 = vector.load %arg5[%c0_18, %c0_19] : memref<128x128xbf16, #tpu.memory_space<vmem>>, vector<128x128xbf16>
      %cst_20 = arith.constant dense<0.000000e+00> : vector<2x128xf32>
      %24 = tpu.matmul %22, %23, %cst_20 {dimension_numbers = #tpu.dot_dimension_numbers<[1], [0], [0], [1], [0, 0, 1, 1], [], []>} : vector<2x128xbf16>, vector<128x128xbf16>, vector<2x128xf32> -> vector<2x128xf32>
      %c0_21 = arith.constant 0 : index
      %c0_22 = arith.constant 0 : index
      %25 = vector.load %arg6[%c0_21, %c0_22] : memref<1x128xf32, #tpu.memory_space<vmem>>, vector<1x128xf32>
      %26 = vector.broadcast %25 : vector<1x128xf32> to vector<2x128xf32>
      %27 = arith.addf %24, %26 : vector<2x128xf32>
      %28 = tpu.iota {dimensions = array<i32: 1>} : vector<2x128xi32>
      %c2_i32 = arith.constant 2 : i32
      %29 = vector.broadcast %c2_i32 : i32 to vector<2x128xi32>
      %30 = arith.cmpi slt, %28, %29 : vector<2x128xi32>
      %cst_23 = arith.constant 0xFF800000 : f32
      %31 = vector.broadcast %cst_23 : f32 to vector<2x128xf32>
      %32 = arith.select %30, %27, %31 : vector<2x128xi1>, vector<2x128xf32>
      %cst_24 = arith.constant dense<0xFF800000> : vector<2xf32>
      %33 = vector.multi_reduction <maximumf>, %32, %cst_24 [1] : vector<2x128xf32> to vector<2xf32>
      %34 = vector.shape_cast %33 : vector<2xf32> to vector<2x1xf32>
      %35 = vector.broadcast %34 : vector<2x1xf32> to vector<2x128xf32>
      %36 = arith.subf %32, %35 : vector<2x128xf32>
      %37 = math.exp %36 : vector<2x128xf32>
      %cst_25 = arith.constant dense<0.000000e+00> : vector<2xf32>
      %38 = vector.multi_reduction <add>, %37, %cst_25 [1] : vector<2x128xf32> to vector<2xf32>
      %39 = vector.shape_cast %38 : vector<2xf32> to vector<2x1xf32>
      %40 = vector.broadcast %39 : vector<2x1xf32> to vector<2x128xf32>
      %41 = arith.divf %37, %40 : vector<2x128xf32>
      %c0_26 = arith.constant 0 : index
      %c0_27 = arith.constant 0 : index
      %42 = vector.load %arg7[%c0_26, %c0_27] : memref<2x128xf32, #tpu.memory_space<vmem>>, vector<2x128xf32>
      tpu.vector_store %arg7[%c0_26, %c0_27], %41 {strides = array<i32>} : memref<2x128xf32, #tpu.memory_space<vmem>>, vector<2x128xf32>,
    } else {
    }
    return
  }
  func.func @transform_0(%arg0: i32) -> (i32, i32) {
    %c0_i32 = arith.constant 0 : i32
    %c0_i32_0 = arith.constant 0 : i32
    return %c0_i32, %arg0 : i32, i32
  }
  func.func @transform_1(%arg0: i32) -> (i32, i32) {
    %c0_i32 = arith.constant 0 : i32
    %c0_i32_0 = arith.constant 0 : i32
    return %arg0, %c0_i32 : i32, i32
  }
  func.func @transform_2(%arg0: i32) -> (i32, i32) {
    %c0_i32 = arith.constant 0 : i32
    %c0_i32_0 = arith.constant 0 : i32
    %c0_i32_1 = arith.constant 0 : i32
    return %c0_i32, %c0_i32_0 : i32, i32
  }
  func.func @transform_3(%arg0: i32) -> (i32, i32) {
    %c0_i32 = arith.constant 0 : i32
    %c0_i32_0 = arith.constant 0 : i32
    %c0_i32_1 = arith.constant 0 : i32
    return %c0_i32, %c0_i32_0 : i32, i32
  }
  func.func @transform_4(%arg0: i32) -> (i32, i32) {
    %c0_i32 = arith.constant 0 : i32
    %c0_i32_0 = arith.constant 0 : i32
    %c0_i32_1 = arith.constant 0 : i32
    return %c0_i32, %c0_i32_0 : i32, i32
  }
  func.func @transform_5(%arg0: i32) -> (i32, i32) {
    %c0_i32 = arith.constant 0 : i32
    %c0_i32_0 = arith.constant 0 : i32
    %c0_i32_1 = arith.constant 0 : i32
    return %c0_i32, %c0_i32_0 : i32, i32
  }
  func.func @transform_6(%arg0: i32) -> (i32, i32) {
    %c0_i32 = arith.constant 0 : i32
    %c0_i32_0 = arith.constant 0 : i32
    %c0_i32_1 = arith.constant 0 : i32
    return %c0_i32, %c0_i32_0 : i32, i32
  }
}

</mosaic_0001>

<bundles_post_ra>
// kernel: gin_classifier_forward.5
= control target key start
LH: loop header
LB: loop body
LE: loop exit
PB: predicated region body
PF: predicated region fallthrough
CT: control target
= control target key end

     0   :  { %s574_s0 = inlined_call_operand.vmem [shape: f32[2,128], index: 0, kind: input, shape index: {}]   ;;  %s575_s1 = inlined_call_operand.vmem [shape: bf16[128,128], index: 1, kind: input, shape index: {}]   ;;  %s576_s2 = inlined_call_operand.vmem [shape: bf16[128,128], index: 2, kind: input, shape index: {}]   ;;  %s577_s3 = inlined_call_operand.vmem [shape: f32[1,128], index: 3, kind: input, shape index: {}]   ;;  %s578_s4 = inlined_call_operand.vmem [shape: bf16[128,128], index: 4, kind: input, shape index: {}]   ;;  %s579_s5 = inlined_call_operand.vmem [shape: f32[1,128], index: 5, kind: input, shape index: {}]   ;;  %s580_s6 = inlined_call_operand.hbm [shape: f32[2,128], index: 6, kind: output, shape index: {}]  }
   0x1   :  { %v418_v0 = vld [vmem:[%s575_s1 + $0x38] sm:$0xff]   ;;  %v417_v1 = vld [vmem:[%s575_s1 + $0x30] sm:$0xff]   ;;  %v416_v6 = vld [vmem:[%s575_s1 + $0x28] sm:$0xff]  }
   0x2   :  { %v411_v2 = vunpack.c.h.bf16 %v418_v0  ;;  %v410_v3 = vunpack.c.l.bf16 %v418_v0  ;;  %v407_v4 = vunpack.c.h.bf16 %v417_v1  ;;  %v371_v5 = vld [vmem:[%s576_s2 + $0x38] sm:$0xff]  ;;  %v406_v7 = vunpack.c.l.bf16 %v417_v1  ;;  %v370_v8 = vld [vmem:[%s576_s2 + $0x30] sm:$0xff] }
   0x3   :  { %158 = vmatpush.bf16.msra.mxu1 %v371_v5 }
   0x4   :  { %63 = vmatpush.msra.mxu0 %v411_v2 }
   0x6   :  { %64 = vmatpush.msra.mxu0 %v410_v3 }
   0x7   :  { %11 = vsyncpa [#allocation4], 0  ;;  %v453_v9 = vmov 0.0   ;;  %v403_v10 = vunpack.c.h.bf16 %v416_v6  ;;  %v415_v11 = vld [vmem:[%s575_s1 + $0x20] sm:$0xff]   ;;  %v402_v12 = vunpack.c.l.bf16 %v416_v6  ;;  %159 = vmatpush.bf16.msra.mxu1 %v370_v8  ;;  %v369_v13 = vld [vmem:[%s576_s2 + $0x28] sm:$0xff]  ;;  %v254_v53 = vlaneseq  ;;  %s291_s25 = sshll.u32 %s580_s6, 4  ;;  %s292_s25 = int_to_ptr.hbm [resolvable:$true] %s291_s25 }
   0x8   :  { %28 = vst [vmem:[#allocation2] sm:$0x3] %v453_v9  ;;  %65 = vmatpush.msra.mxu0 %v407_v4  ;;  %v399_v14 = vunpack.c.h.bf16 %v415_v11  ;;  %v414_v15 = vld [vmem:[%s575_s1 + $0x18] sm:$0xff]   ;;  %v398_v16 = vunpack.c.l.bf16 %v415_v11  ;;  %v368_v17 = vld [vmem:[%s576_s2 + $0x20] sm:$0xff]  ;;  %v413_v19 = vld [vmem:[%s575_s1 + $0x10] sm:$0xff]   ;;  %vm258_vm1 = vcmask 1041408  }
   0x9   :  { %v395_v18 = vunpack.c.h.bf16 %v414_v15  ;;  %v394_v20 = vunpack.c.l.bf16 %v414_v15  ;;  %v367_v21 = vld [vmem:[%s576_s2 + $0x18] sm:$0xff]  ;;  %v391_v22 = vunpack.c.h.bf16 %v413_v19  ;;  %v412_v23 = vld [vmem:[%s575_s1 + $0x8] sm:$0xff]   ;;  %v390_v24 = vunpack.c.l.bf16 %v413_v19  ;;  %v381_v26 = vld [vmem:[%s575_s1] sm:$0xff]  }
   0xa   :  { %66 = vmatpush.msra.mxu0 %v406_v7  ;;  %v387_v25 = vunpack.c.h.bf16 %v412_v23  ;;  %v386_v27 = vunpack.c.l.bf16 %v412_v23  ;;  %v383_v28 = vunpack.c.h.bf16 %v381_v26  ;;  %v382_v29 = vunpack.c.l.bf16 %v381_v26  ;;  %v30_v30 = vld [vmem:[%s574_s0] sm:$0x3]  ;;  %v366_v31 = vld [vmem:[%s576_s2 + $0x10] sm:$0xff]  ;;  %v365_v32 = vld [vmem:[%s576_s2 + $0x8] sm:$0xff] }
   0xb   :  { %160 = vmatpush.bf16.msra.mxu1 %v369_v13  ;;  %v364_v33 = vld [vmem:[%s576_s2] sm:$0xff]  ;;  %v379_v34 = vld [vmem:[%s578_s4 + $0x38] sm:$0xff]  ;;  %v378_v35 = vld [vmem:[%s578_s4 + $0x30] sm:$0xff]  ;;  %v255_v54 = vand.u32 127, %v254_v53 }
   0xc   :  { %67 = vmatpush.msra.mxu0 %v403_v10  ;;  %241 = vmatpush.bf16.msra.mxu2 %v379_v34  ;;  %v377_v36 = vld [vmem:[%s578_s4 + $0x28] sm:$0xff]  ;;  %v376_v37 = vld [vmem:[%s578_s4 + $0x20] sm:$0xff]  ;;  %v375_v38 = vld [vmem:[%s578_s4 + $0x18] sm:$0xff] }
   0xd   :  { %v374_v40 = vld [vmem:[%s578_s4 + $0x10] sm:$0xff]  ;;  %v373_v45 = vld [vmem:[%s578_s4 + $0x8] sm:$0xff]  ;;  %v372_v46 = vld [vmem:[%s578_s4] sm:$0xff]  ;;  %vm256_vm0 = vcmp.lt.s32.totalorder %v255_v54, 2 }
   0xe   :  { %68 = vmatpush.msra.mxu0 %v402_v12  ;;  %v421_v47 = vld [vmem:[%s577_s3] ss:$0 sm:$0xff]  ;;  %s454_s3 = smov [#allocation3]  }
   0xf   :  { %161 = vmatpush.bf16.msra.mxu1 %v368_v17  ;;  %v29_v39 = vld [vmem:[#allocation2] sm:$0x3]  ;;  %s289_s4 = sshll.u32 %s454_s3, 4  ;;  %s290_s4 = int_to_ptr.vmem [resolvable:$true] %s289_s4 }
  0x10   :  { %69 = vmatpush.msra.mxu0 %v399_v14  ;;  %242 = vmatpush.bf16.msra.mxu2 %v378_v35  ;;  %v422_v55 = vld [vmem:[%s579_s5] ss:$0 sm:$0xff] }
  0x12   :  { %70 = vmatpush.msra.mxu0 %v398_v16 }
  0x13   :  { %162 = vmatpush.bf16.msra.mxu1 %v367_v21 }
  0x14   :  { %71 = vmatpush.msra.mxu0 %v395_v18  ;;  %243 = vmatpush.bf16.msra.mxu2 %v377_v36 }
  0x16   :  { %72 = vmatpush.msra.mxu0 %v394_v20 }
  0x17   :  { %163 = vmatpush.bf16.msra.mxu1 %v366_v31 }
  0x18   :  { %73 = vmatpush.msra.mxu0 %v391_v22  ;;  %244 = vmatpush.bf16.msra.mxu2 %v376_v37 }
  0x1a   :  { %74 = vmatpush.msra.mxu0 %v390_v24 }
  0x1b   :  { %164 = vmatpush.bf16.msra.mxu1 %v365_v32 }
  0x1c   :  { %75 = vmatpush.msra.mxu0 %v387_v25  ;;  %245 = vmatpush.bf16.msra.mxu2 %v375_v38 }
  0x1e   :  { %76 = vmatpush.msra.mxu0 %v386_v27 }
  0x1f   :  { %165 = vmatpush.bf16.msra.mxu1 %v364_v33 }
  0x20   :  { %77 = vmatpush.msra.mxu0 %v383_v28  ;;  %246 = vmatpush.bf16.msra.mxu2 %v374_v40 }
  0x22   :  { %78 = vmatpush.msra.mxu0 %v382_v29 }
  0x23   :  { %79 = vmatmul.f32.vlgmr.msra.gmra.mxu0 %v30_v30 }
  0x24   :  { %247 = vmatpush.bf16.msra.mxu2 %v373_v45 }
  0x28   :  { %248 = vmatpush.bf16.msra.mxu2 %v372_v46 }
  0xa0   :  { %v80_v41 = vpop.f32.mrf.mxu0 }
  0xa1   :  { %v83_v42 = vadd.f32 %v80_v41, %v29_v39 }
  0xa3   :  { %84 = vst [vmem:[#allocation2] sm:$0x3] %v83_v42 }
  0xaa   :  { %v88_v43 = vld [vmem:[#allocation2] sm:$0x3] }
  0xab   :  { %v89_v44 = vpack.c.bf16 %v88_v43, %v88_v43 }
  0xad   :  { %166 = vmatmul.bf16.vlgmr.msra.gmra.mxu1 %v89_v44 }
 0x12a   :  { %v167_v48 = vpop.f32.mrf.mxu1 }
 0x12b   :  { %v168_v49 = vadd.f32 %v421_v47, %v167_v48 }
 0x12d   :  { %v171_v50 = vmax.f32 %v168_v49, 0.0 }
 0x12f   :  { %v172_v51 = vpack.c.bf16 %v171_v50, %v171_v50 }
 0x131   :  { %249 = vmatmul.bf16.vlgmr.msra.gmra.mxu2 %v172_v51 }
 0x132   :  { %v169_v52 = vpop.f32.mrf.mxu1 }
 0x1b4   :  { %v250_v56 = vpop.f32.mrf.mxu2 }
 0x1b5   :  { %v251_v57 = vadd.f32 %v422_v55, %v250_v56 }
 0x1b7   :  { %v257_v58 = vsel %vm256_vm0, %v251_v57, -inf }
 0x1b8   :  { %v259_v59 = vsel %vm258_vm1, %v257_v58, -inf }
 0x1b9   :  { %260 = vmax.xlane.f32.xlu0 %v259_v59 }
 0x1bc   :  { %v252_v60 = vpop.f32.mrf.mxu2 }
 0x22c   :  { %v261_v61 = vpop.xlane.xlu0 %260 }
 0x22d   :  { %v262_v62 = vsub.f32 %v257_v58, %v261_v61 }
 0x22f   :  { %v263_v63 = vmul.f32 1.442695, %v262_v62 }
 0x231   :  { %423 = vpow2.f32 %v263_v63 }
 0x237   :  { %v424_v0 = vpop.eup %423 }
 0x238   :  { %v265_v1 = vsel %vm258_vm1, %v424_v0, 0.0 }
 0x239   :  { %266 = vadd.xlane.f32.xlu0 %v265_v1 }
 0x2ac   :  { %v267_v2 = vpop.xlane.xlu0 %266 }
 0x2ad   :  { %425 = vrcp.f32 %v267_v2  ;;  %v279_v6 = vand.u32 2147483648, %v267_v2  ;;  %v277_v8 = vand.u32 2147483647, %v267_v2  ;;  %vm273_vm3 = vweird.f32 %v267_v2 }
 0x2af   :  { %v280_v10 = vor.u32 1.1754944e-38, %v279_v6  ;;  %vm278_vm5 = vcmp.eq.f32.partialorder %v277_v8, 8.507059e+37 }
 0x2b3   :  { %v426_v3 = vpop.eup %425 }
 0x2b4   :  { %v269_v4 = vmul.f32 %v426_v3, %v267_v2  ;;  %vm274_vm2 = vweird.f32 %v426_v3 }
 0x2b5   :  { %vm275_vm4 = vmor %vm273_vm3, %vm274_vm2 }
 0x2b6   :  { %v270_v5 = vsub.f32 1.0, %v269_v4 }
 0x2b8   :  { %v271_v7 = vmul.f32 %v426_v3, %v270_v5 }
 0x2ba   :  { %v272_v9 = vadd.f32 %v426_v3, %v271_v7 }
 0x2bc   :  { %v276_v11 = vsel %vm275_vm4, %v426_v3, %v272_v9 }
 0x2bd   :  { %v281_v12 = vsel %vm278_vm5, %v280_v10, %v276_v11 }
 0x2be   :  { %v282_v13 = vmul.f32 %v424_v0, %v281_v12 }
 0x2c0   :  { %283 = vst [vmem:[#allocation3] sm:$0x3] %v282_v13 }
 0x2c1   :  { %294 = dma.vmem_to_hbm [thread:$0]  %s290_s4, 32, %s292_s25, [#allocation4]  }
 0x2c2   :  { %451 = dma.done.wait [#allocation4], 32  }
 0x2c3   :  { %452 = vsyncadd [#allocation4], 4294967264 }
 0x2c4   :  { %299 = vsyncpa [#allocation4], 1 }

// kernel: gin_classifier_forward.3
= control target key start
LH: loop header
LB: loop body
LE: loop exit
PB: predicated region body
PF: predicated region fallthrough
CT: control target
= control target key end

     0   :  { %v1095_v0 = vmov 0.0   ;;  %s1345_s0 = inlined_call_operand.<no memory space> [shape: s32[1,1], index: 0, kind: input, shape index: {}]   ;;  %s1346_s1 = inlined_call_operand.<no memory space> [shape: s32[1], index: 1, kind: input, shape index: {}]   ;;  %s1347_s4 = inlined_call_operand.vmem [shape: bf16[128,128], index: 4, kind: input, shape index: {}]   ;;  %s1348_s5 = inlined_call_operand.vmem [shape: f32[1,128], index: 5, kind: input, shape index: {}]   ;;  %s1349_s6 = inlined_call_operand.vmem [shape: bf16[128,128], index: 6, kind: input, shape index: {}]   ;;  %s1350_s7 = inlined_call_operand.vmem [shape: f32[1,128], index: 7, kind: input, shape index: {}]   ;;  %s1351_s8 = inlined_call_operand.vmem [shape: bf16[128,128], index: 8, kind: output, shape index: {}]   ;;  %s1352_s2 = inlined_call_operand.vmem [shape: bf16[128,128], index: 2, kind: input, shape index: {}]   ;;  %s1353_s3 = inlined_call_operand.vmem [shape: bf16[128,128], index: 3, kind: input, shape index: {}]  }
   0x1   :  { %13 = sst [smem:[#allocation4]] %s1345_s0  ;;  %p74_p0 = scmp.lt.s32.totalorder %s1345_s0, 0  ;;  %100 = vst [vmem:[#allocation2 + $0x30] sm:$0xff] %v1095_v0 }
   0x2   :  { %s840_s11 = sshll.u32 %s1345_s0, 4  ;;  %101 = vst [vmem:[#allocation2] sm:$0xff] %v1095_v0  ;;  %p843_p2 = scmp.le.s32.totalorder %s1346_s1, 0 }
   0x3   :  { %s1355_s0 = smov (!%p74_p0, %s1345_s0), 0  ;;  %102 = vst [vmem:[#allocation2 + $0x58] sm:$0xff] %v1095_v0  ;;  %p87_p1 = scmp.lt.s32.totalorder %s840_s11, 15 }
   0x4   :  { %103 = vst [vmem:[#allocation2 + $0x18] sm:$0xff] %v1095_v0  ;;  %s839_s14 = sshll.u32 %s1355_s0, 2 }
   0x5   :  { %104 = vst [vmem:[#allocation2 + $0x50] sm:$0xff] %v1095_v0  ;;  %s1156_s17 = scalar_lea.vmem %s1352_s2, %s839_s14  ;;  %s1357_s11 = smov (!%p87_p1, %s840_s11), 15 }
   0x6   :  { %105 = vst [vmem:[#allocation2 + $0x68] sm:$0xff] %v1095_v0  ;;  %s841_s18 = sshll.u32 %s1357_s11, 2 }
   0x7   :  { %106 = vst [vmem:[#allocation2 + $0x8] sm:$0xff] %v1095_v0  ;;  %s1161_s21 = scalar_lea.vmem %s1353_s3, %s841_s18 }
   0x8   :  { %107 = vst [vmem:[#allocation2 + $0x48] sm:$0xff] %v1095_v0 }
   0x9   :  { %108 = vst [vmem:[#allocation2 + $0x40] sm:$0xff] %v1095_v0 }
   0xa   :  { %109 = vst [vmem:[#allocation2 + $0x20] sm:$0xff] %v1095_v0 }
   0xb   :  { %110 = vst [vmem:[#allocation2 + $0x10] sm:$0xff] %v1095_v0 }
   0xc   :  { %111 = vst [vmem:[#allocation2 + $0x38] sm:$0xff] %v1095_v0  ;;  %120 = sbr.rel (%p843_p2) target bundleno = 485 (0x1e5), region = 33 }
   0xd   :  { %112 = vst [vmem:[#allocation2 + $0x60] sm:$0xff] %v1095_v0 }
   0xe   :  { %113 = vst [vmem:[#allocation2 + $0x70] sm:$0xff] %v1095_v0 }
   0xf   :  { %114 = vst [vmem:[#allocation2 + $0x78] sm:$0xff] %v1095_v0 }
  0x10   :  { %115 = vst [vmem:[#allocation2 + $0x28] sm:$0xff] %v1095_v0 }
  0x11   :  { %v988_v1 = vld [vmem:[%s1347_s4 + $0x38] sm:$0xff]  ;;  %v987_v2 = vld [vmem:[%s1347_s4 + $0x30] sm:$0xff]  ;;  %v986_v3 = vld [vmem:[%s1347_s4 + $0x28] sm:$0xff] }
  0x12   :  { %1052 = vmatpush.bf16.msra.mxu2 %v988_v1  ;;  %249 = vmatpush.bf16.msra.mxu0 %v988_v1  ;;  %v985_v4 = vld [vmem:[%s1347_s4 + $0x20] sm:$0xff]  ;;  %v984_v5 = vld [vmem:[%s1347_s4 + $0x18] sm:$0xff]  ;;  %v983_v6 = vld [vmem:[%s1347_s4 + $0x10] sm:$0xff] }
  0x13   :  { %v982_v7 = vld [vmem:[%s1347_s4 + $0x8] sm:$0xff]  ;;  %v981_v8 = vld [vmem:[%s1347_s4] sm:$0xff]  ;;  %v979_v13 = vld [vmem:[%s1161_s21 + $0x30] sm:$0xff]  ;;  %s1254_s4 = sld [smem:[#allocation4]] }
  0x14   :  { %v977_v9 = vld [vmem:[%s1161_s21 + $0x20] sm:$0xff]  ;;  %v978_v11 = vld [vmem:[%s1161_s21 + $0x28] sm:$0xff]  ;;  %v975_v14 = vld [vmem:[%s1161_s21 + $0x10] sm:$0xff] }
  0x15   :  { %v973_v10 = vld [vmem:[%s1161_s21] sm:$0xff]  ;;  %v974_v12 = vld [vmem:[%s1161_s21 + $0x8] sm:$0xff]  ;;  %v980_v15 = vld [vmem:[%s1161_s21 + $0x38] sm:$0xff] }
  0x16   :  { %1053 = vmatpush.bf16.msra.mxu2 %v987_v2  ;;  %250 = vmatpush.bf16.msra.mxu0 %v987_v2  ;;  %v976_v16 = vld [vmem:[%s1161_s21 + $0x18] sm:$0xff] }
  0x19   :  { %p940_p3 = scmp.ne.s32.totalorder %s1254_s4, 0 }
  0x1a   :  { %1054 = vmatpush.bf16.msra.mxu2 %v986_v3  ;;  %251 = vmatpush.bf16.msra.mxu0 %v986_v3 }
  0x1e   :  { %1055 = vmatpush.bf16.msra.mxu2 %v985_v4  ;;  %252 = vmatpush.bf16.msra.mxu0 %v985_v4 }
  0x22   :  { %1056 = vmatpush.bf16.msra.mxu2 %v984_v5  ;;  %253 = vmatpush.bf16.msra.mxu0 %v984_v5 }
  0x26   :  { %1057 = vmatpush.bf16.msra.mxu2 %v983_v6  ;;  %254 = vmatpush.bf16.msra.mxu0 %v983_v6 }
  0x2a   :  { %1058 = vmatpush.bf16.msra.mxu2 %v982_v7  ;;  %255 = vmatpush.bf16.msra.mxu0 %v982_v7 }
  0x2e   :  { %1059 = vmatpush.bf16.msra.mxu2 %v981_v8  ;;  %256 = vmatpush.bf16.msra.mxu0 %v981_v8 }
  0x31   :  { %277 = vmatmul.bf16.vlgmr.msra.gmra.mxu2 %v977_v9  ;;  %257 = vmatmul.bf16.vlgmr.msra.gmra.mxu0 %v973_v10  ;;  %v989_v9 = vld [vmem:[%s1156_s17] sm:$0xff] }
  0x32   :  { %v993_v10 = vld [vmem:[%s1156_s17 + $0x20] sm:$0xff] }
  0x41   :  { %282 = vmatmul.bf16.gmra.mxu2 %v978_v11  ;;  %262 = vmatmul.bf16.gmra.mxu0 %v974_v12  ;;  %v990_v11 = vld [vmem:[%s1156_s17 + $0x8] sm:$0xff] }
  0x42   :  { %v994_v12 = vld [vmem:[%s1156_s17 + $0x28] sm:$0xff] }
  0x51   :  { %287 = vmatmul.bf16.gmra.mxu2 %v979_v13  ;;  %267 = vmatmul.bf16.gmra.mxu0 %v975_v14  ;;  %v991_v13 = vld [vmem:[%s1156_s17 + $0x10] sm:$0xff] }
  0x52   :  { %v995_v14 = vld [vmem:[%s1156_s17 + $0x30] sm:$0xff] }
  0x61   :  { %292 = vmatmul.bf16.gmra.mxu2 %v980_v15  ;;  %272 = vmatmul.bf16.gmra.mxu0 %v976_v16  ;;  %v992_v15 = vld [vmem:[%s1156_s17 + $0x18] sm:$0xff] }
  0x62   :  { %v996_v16 = vld [vmem:[%s1156_s17 + $0x38] sm:$0xff] }
  0xae   :  { %v258_v17 = vpop.f32.mrf.mxu0 }
  0xaf   :  { %v1238_v0 = vpack.c.bf16 %v258_v17, %v258_v17  ;;  %v314_v17 = vld [vmem:[#allocation2 + $0x30] sm:$0xff] }
  0xb1   :  { %v410_v5 = vunpack.c.l.b16 %v1238_v0 }
  0xb4   :  { %v278_v18 = vpop.f32.mrf.mxu2 }
  0xb5   :  { %v1217_v46 = vpack.c.bf16 %v278_v18, %v278_v18 }
  0xb6   :  { %v260_v19 = vpop.f32.mrf.mxu0 }
  0xb7   :  { %v418_v53 = vunpack.c.l.b16 %v1217_v46  ;;  %v1240_v1 = vpack.c.bf16 %v260_v19, %v260_v19 }
  0xb9   :  { %v411_v6 = vunpack.c.l.b16 %v1240_v1 }
  0xbb   :  { %v426_v8 = vpack.c.b16 %v411_v6, %v410_v5 }
  0xbc   :  { %v280_v20 = vpop.f32.mrf.mxu2 }
  0xbd   :  { %v1214_v43 = vpack.c.bf16 %v280_v20, %v280_v20  ;;  %v322_v20 = vld [vmem:[#allocation2 + $0x40] sm:$0xff] }
  0xbe   :  { %v263_v22 = vpop.f32.mrf.mxu0 }
  0xbf   :  { %v419_v49 = vunpack.c.l.b16 %v1214_v43  ;;  %v1232_v59 = vpack.c.bf16 %v263_v22, %v263_v22  ;;  %v315_v22 = vld [vmem:[#allocation2] sm:$0xff] }
  0xc1   :  { %v430_v54 = vpack.c.b16 %v419_v49, %v418_v53  ;;  %v412_v2 = vunpack.c.l.b16 %v1232_v59 }
  0xc4   :  { %v283_v21 = vpop.f32.mrf.mxu2 }
  0xc5   :  { %v1211_v41 = vpack.c.bf16 %v283_v21, %v283_v21 }
  0xc6   :  { %v265_v24 = vpop.f32.mrf.mxu0 }
  0xc7   :  { %v420_v48 = vunpack.c.l.b16 %v1211_v41  ;;  %v1234_v60 = vpack.c.bf16 %v265_v24, %v265_v24 }
  0xc9   :  { %v413_v3 = vunpack.c.l.b16 %v1234_v60 }
  0xcb   :  { %v427_v7 = vpack.c.b16 %v413_v3, %v412_v2  ;;  %v327_v2 = vld [vmem:[#allocation2 + $0x70] sm:$0xff] }
  0xcc   :  { %v285_v23 = vpop.f32.mrf.mxu2 }
  0xcd   :  { %v1208_v38 = vpack.c.bf16 %v285_v23, %v285_v23 }
  0xce   :  { %v268_v26 = vpop.f32.mrf.mxu0 }
  0xcf   :  { %v421_v44 = vunpack.c.l.b16 %v1208_v38  ;;  %v1226_v55 = vpack.c.bf16 %v268_v26, %v268_v26  ;;  %v323_v26 = vld [vmem:[#allocation2 + $0x20] sm:$0xff] }
  0xd1   :  { %v431_v52 = vpack.c.b16 %v421_v44, %v420_v48  ;;  %v414_v61 = vunpack.c.l.b16 %v1226_v55  ;;  %v318_v48 = vld [vmem:[#allocation2 + $0x50] sm:$0xff] }
  0xd4   :  { %v288_v25 = vpop.f32.mrf.mxu2 }
  0xd5   :  { %v1204_v35 = vpack.c.bf16 %v288_v25, %v288_v25 }
  0xd6   :  { %v270_v28 = vpop.f32.mrf.mxu0 }
  0xd7   :  { %v422_v42 = vunpack.c.l.b16 %v1204_v35  ;;  %v1228_v56 = vpack.c.bf16 %v270_v28, %v270_v28  ;;  %v316_v28 = vld [vmem:[#allocation2 + $0x58] sm:$0xff] }
  0xd9   :  { %v415_v62 = vunpack.c.l.b16 %v1228_v56 }
  0xdb   :  { %v428_v4 = vpack.c.b16 %v415_v62, %v414_v61 }
  0xdc   :  { %v290_v27 = vpop.f32.mrf.mxu2 }
  0xdd   :  { %v1200_v33 = vpack.c.bf16 %v290_v27, %v290_v27 }
  0xde   :  { %v273_v31 = vpop.f32.mrf.mxu0 }
  0xdf   :  { %v423_v39 = vunpack.c.l.b16 %v1200_v33  ;;  %v1221_v50 = vpack.c.bf16 %v273_v31, %v273_v31 }
  0xe1   :  { %v432_v45 = vpack.c.b16 %v423_v39, %v422_v42  ;;  %v416_v57 = vunpack.c.l.b16 %v1221_v50  ;;  %v317_v39 = vld [vmem:[#allocation2 + $0x18] sm:$0xff] }
  0xe4   :  { %v293_v29 = vpop.f32.mrf.mxu2 }
  0xe5   :  { %v1198_v30 = vpack.c.bf16 %v293_v29, %v293_v29 }
  0xe6   :  { %v275_v47 = vpop.f32.mrf.mxu0 }
  0xe7   :  { %v424_v36 = vunpack.c.l.b16 %v1198_v30  ;;  %v1223_v51 = vpack.c.bf16 %v275_v47, %v275_v47 }
  0xe9   :  { %v417_v58 = vunpack.c.l.b16 %v1223_v51 }
  0xeb   :  { %v429_v63 = vpack.c.b16 %v417_v58, %v416_v57  ;;  %v319_v58 = vld [vmem:[#allocation2 + $0x68] sm:$0xff] }
  0xec   :  { %v295_v32 = vpop.f32.mrf.mxu2 }
  0xed   :  { %v1202_v34 = vpack.c.bf16 %v295_v32, %v295_v32 }
  0xef   :  { %v425_v37 = vunpack.c.l.b16 %v1202_v34 }
  0xf1   :  { %v433_v40 = vpack.c.b16 %v425_v37, %v424_v36  ;;  %v324_v36 = vld [vmem:[#allocation2 + $0x10] sm:$0xff] }
  0xf3   :  { %442 = vmatpush.bf16.msra.mxu1 %v433_v40  ;;  %1060 = vmatpush.bf16.msra.mxu3 %v433_v40 }
  0xf7   :  { %443 = vmatpush.bf16.msra.mxu1 %v432_v45  ;;  %1061 = vmatpush.bf16.msra.mxu3 %v432_v45  ;;  %v325_v45 = vld [vmem:[#allocation2 + $0x38] sm:$0xff] }
  0xfb   :  { %444 = vmatpush.bf16.msra.mxu1 %v431_v52  ;;  %1062 = vmatpush.bf16.msra.mxu3 %v431_v52 }
  0xff   :  { %445 = vmatpush.bf16.msra.mxu1 %v430_v54  ;;  %1063 = vmatpush.bf16.msra.mxu3 %v430_v54  ;;  %v326_v54 = vld [vmem:[#allocation2 + $0x60] sm:$0xff] }
 0x103   :  { %446 = vmatpush.bf16.msra.mxu1 %v429_v63  ;;  %1064 = vmatpush.bf16.msra.mxu3 %v429_v63 }
 0x107   :  { %447 = vmatpush.bf16.msra.mxu1 %v428_v4  ;;  %1065 = vmatpush.bf16.msra.mxu3 %v428_v4  ;;  %v320_v4 = vld [vmem:[#allocation2 + $0x8] sm:$0xff] }
 0x10b   :  { %448 = vmatpush.bf16.msra.mxu1 %v427_v7  ;;  %1066 = vmatpush.bf16.msra.mxu3 %v427_v7 }
 0x10f   :  { %449 = vmatpush.bf16.msra.mxu1 %v426_v8  ;;  %1067 = vmatpush.bf16.msra.mxu3 %v426_v8  ;;  %v328_v8 = vld [vmem:[#allocation2 + $0x78] sm:$0xff] }
 0x112   :  { %450 = vmatmul.bf16.vlgmr.msra.gmra.mxu1 %v989_v9  ;;  %470 = vmatmul.bf16.vlgmr.msra.gmra.mxu3 %v993_v10  ;;  %v321_v10 = vld [vmem:[#allocation2 + $0x48] sm:$0xff] }
 0x122   :  { %455 = vmatmul.bf16.gmra.mxu1 %v990_v11  ;;  %475 = vmatmul.bf16.gmra.mxu3 %v994_v12 }
 0x132   :  { %460 = vmatmul.bf16.gmra.mxu1 %v991_v13  ;;  %480 = vmatmul.bf16.gmra.mxu3 %v995_v14  ;;  %v329_v14 = vld [vmem:[#allocation2 + $0x28] sm:$0xff] }
 0x142   :  { %465 = vmatmul.bf16.gmra.mxu1 %v992_v15  ;;  %485 = vmatmul.bf16.gmra.mxu3 %v996_v16 }
 0x18f   :  { %v451_v18 = vpop.f32.mrf.mxu1 }
 0x190   :  { %v491_v19 = vadd.f32 %v451_v18, %v314_v17 }
 0x192   :  { %507 = vst [vmem:[#allocation2 + $0x30] sm:$0xff] %v491_v19 }
 0x195   :  { %v471_v21 = vpop.f32.mrf.mxu3 }
 0x196   :  { %v499_v23 = vadd.f32 %v471_v21, %v322_v20 }
 0x197   :  { %v453_v24 = vpop.f32.mrf.mxu1 }
 0x198   :  { %515 = vst [vmem:[#allocation2 + $0x40] sm:$0xff] %v499_v23  ;;  %v492_v25 = vadd.f32 %v453_v24, %v315_v22 }
 0x19a   :  { %508 = vst [vmem:[#allocation2] sm:$0xff] %v492_v25 }
 0x19d   :  { %v473_v27 = vpop.f32.mrf.mxu3 }
 0x19e   :  { %v500_v29 = vadd.f32 %v473_v27, %v323_v26 }
 0x19f   :  { %v456_v31 = vpop.f32.mrf.mxu1 }
 0x1a0   :  { %516 = vst [vmem:[#allocation2 + $0x20] sm:$0xff] %v500_v29  ;;  %v493_v32 = vadd.f32 %v456_v31, %v316_v28 }
 0x1a2   :  { %509 = vst [vmem:[#allocation2 + $0x58] sm:$0xff] %v493_v32 }
 0x1a5   :  { %v476_v37 = vpop.f32.mrf.mxu3 }
 0x1a6   :  { %v501_v40 = vadd.f32 %v476_v37, %v324_v36 }
 0x1a7   :  { %v458_v42 = vpop.f32.mrf.mxu1 }
 0x1a8   :  { %517 = vst [vmem:[#allocation2 + $0x10] sm:$0xff] %v501_v40  ;;  %v494_v44 = vadd.f32 %v458_v42, %v317_v39 }
 0x1aa   :  { %510 = vst [vmem:[#allocation2 + $0x18] sm:$0xff] %v494_v44 }
 0x1ad   :  { %v478_v47 = vpop.f32.mrf.mxu3 }
 0x1ae   :  { %v502_v49 = vadd.f32 %v478_v47, %v325_v45 }
 0x1af   :  { %v461_v52 = vpop.f32.mrf.mxu1 }
 0x1b0   :  { %518 = vst [vmem:[#allocation2 + $0x38] sm:$0xff] %v502_v49  ;;  %v495_v53 = vadd.f32 %v461_v52, %v318_v48 }
 0x1b2   :  { %511 = vst [vmem:[#allocation2 + $0x50] sm:$0xff] %v495_v53 }
 0x1b5   :  { %v481_v57 = vpop.f32.mrf.mxu3 }
 0x1b6   :  { %v503_v61 = vadd.f32 %v481_v57, %v326_v54 }
 0x1b7   :  { %v463_v62 = vpop.f32.mrf.mxu1 }
 0x1b8   :  { %519 = vst [vmem:[#allocation2 + $0x60] sm:$0xff] %v503_v61  ;;  %v496_v63 = vadd.f32 %v463_v62, %v319_v58 }
 0x1ba   :  { %512 = vst [vmem:[#allocation2 + $0x68] sm:$0xff] %v496_v63 }
 0x1bd   :  { %v483_v3 = vpop.f32.mrf.mxu3 }
 0x1be   :  { %v504_v5 = vadd.f32 %v483_v3, %v327_v2 }
 0x1bf   :  { %v466_v6 = vpop.f32.mrf.mxu1 }
 0x1c0   :  { %520 = vst [vmem:[#allocation2 + $0x70] sm:$0xff] %v504_v5  ;;  %v497_v7 = vadd.f32 %v466_v6, %v320_v4 }
 0x1c2   :  { %513 = vst [vmem:[#allocation2 + $0x8] sm:$0xff] %v497_v7 }
 0x1c5   :  { %v486_v9 = vpop.f32.mrf.mxu3 }
 0x1c6   :  { %v505_v11 = vadd.f32 %v486_v9, %v328_v8 }
 0x1c7   :  { %v468_v12 = vpop.f32.mrf.mxu1 }
 0x1c8   :  { %521 = vst [vmem:[#allocation2 + $0x78] sm:$0xff] %v505_v11  ;;  %v498_v13 = vadd.f32 %v468_v12, %v321_v10 }
 0x1ca   :  { %514 = vst [vmem:[#allocation2 + $0x48] sm:$0xff] %v498_v13 }
 0x1cc   :  { %530 = sbr.rel (%p940_p3) target bundleno = 485 (0x1e5), region = 37 }
 0x1cd   :  { %v488_v15 = vpop.f32.mrf.mxu3 }
 0x1ce   :  { %v506_v16 = vadd.f32 %v488_v15, %v329_v14 }
 0x1d0   :  { %522 = vst [vmem:[#allocation2 + $0x28] sm:$0xff] %v506_v16 }
 0x1d1   :  { %v531_v17 = vld [vmem:[#allocation2 + $0x30] sm:$0xff]  ;;  %v547_v18 = vunpack.c.l.bf16 %v1238_v0  ;;  %v532_v19 = vld [vmem:[#allocation2] sm:$0xff]  ;;  %v548_v20 = vunpack.c.l.bf16 %v1240_v1  ;;  %v533_v21 = vld [vmem:[#allocation2 + $0x58] sm:$0xff]  ;;  %v549_v22 = vunpack.c.l.bf16 %v1232_v59  ;;  %v550_v23 = vunpack.c.l.bf16 %v1234_v60 }
 0x1d2   :  { %v534_v24 = vld [vmem:[#allocation2 + $0x18] sm:$0xff]  ;;  %v535_v25 = vld [vmem:[#allocation2 + $0x50] sm:$0xff]  ;;  %v551_v26 = vunpack.c.l.bf16 %v1226_v55  ;;  %v552_v27 = vunpack.c.l.bf16 %v1228_v56  ;;  %v536_v32 = vld [vmem:[#allocation2 + $0x68] sm:$0xff]  ;;  %v553_v0 = vunpack.c.l.bf16 %v1221_v50  ;;  %v554_v1 = vunpack.c.l.bf16 %v1223_v51 }
 0x1d3   :  { %v563_v28 = vadd.f32 %v547_v18, %v531_v17  ;;  %v564_v29 = vadd.f32 %v548_v20, %v532_v19  ;;  %v565_v31 = vadd.f32 %v549_v22, %v533_v21  ;;  %v566_v36 = vadd.f32 %v550_v23, %v534_v24  ;;  %v537_v37 = vld [vmem:[#allocation2 + $0x8] sm:$0xff]  ;;  %v539_v55 = vld [vmem:[#allocation2 + $0x40] sm:$0xff]  ;;  %v541_v47 = vld [vmem:[#allocation2 + $0x10] sm:$0xff] }
 0x1d4   :  { %v567_v59 = vadd.f32 %v551_v26, %v535_v25  ;;  %v538_v39 = vld [vmem:[#allocation2 + $0x48] sm:$0xff]  ;;  %v555_v60 = vunpack.c.l.bf16 %v1217_v46  ;;  %v568_v40 = vadd.f32 %v552_v27, %v536_v32  ;;  %v556_v56 = vunpack.c.l.bf16 %v1214_v43  ;;  %v540_v44 = vld [vmem:[#allocation2 + $0x20] sm:$0xff]  ;;  %v542_v49 = vld [vmem:[#allocation2 + $0x38] sm:$0xff] }
 0x1d5   :  { %579 = vst [vmem:[#allocation2 + $0x30] sm:$0xff] %v563_v28  ;;  %v569_v42 = vadd.f32 %v553_v0, %v537_v37  ;;  %v557_v45 = vunpack.c.l.bf16 %v1211_v41  ;;  %v570_v50 = vadd.f32 %v554_v1, %v538_v39  ;;  %v558_v51 = vunpack.c.l.bf16 %v1208_v38  ;;  %v543_v53 = vld [vmem:[#allocation2 + $0x60] sm:$0xff]  ;;  %v544_v57 = vld [vmem:[#allocation2 + $0x70] sm:$0xff]  ;;  %v545_v61 = vld [vmem:[#allocation2 + $0x78] sm:$0xff] }
 0x1d6   :  { %580 = vst [vmem:[#allocation2] sm:$0xff] %v564_v29  ;;  %v571_v48 = vadd.f32 %v555_v60, %v539_v55  ;;  %v559_v46 = vunpack.c.l.bf16 %v1204_v35  ;;  %v572_v52 = vadd.f32 %v556_v56, %v540_v44  ;;  %v560_v43 = vunpack.c.l.bf16 %v1200_v33 }
 0x1d7   :  { %581 = vst [vmem:[#allocation2 + $0x58] sm:$0xff] %v565_v31  ;;  %v573_v54 = vadd.f32 %v557_v45, %v541_v47  ;;  %v561_v41 = vunpack.c.l.bf16 %v1198_v30  ;;  %v574_v58 = vadd.f32 %v558_v51, %v542_v49  ;;  %v562_v38 = vunpack.c.l.bf16 %v1202_v34  ;;  %v546_v63 = vld [vmem:[#allocation2 + $0x28] sm:$0xff] }
 0x1d8   :  { %582 = vst [vmem:[#allocation2 + $0x18] sm:$0xff] %v566_v36  ;;  %v575_v62 = vadd.f32 %v559_v46, %v543_v53  ;;  %v576_v35 = vadd.f32 %v560_v43, %v544_v57 }
 0x1d9   :  { %583 = vst [vmem:[#allocation2 + $0x50] sm:$0xff] %v567_v59  ;;  %v577_v2 = vadd.f32 %v561_v41, %v545_v61  ;;  %v578_v3 = vadd.f32 %v562_v38, %v546_v63 }
 0x1da   :  { %584 = vst [vmem:[#allocation2 + $0x68] sm:$0xff] %v568_v40 }
 0x1db   :  { %585 = vst [vmem:[#allocation2 + $0x8] sm:$0xff] %v569_v42 }
 0x1dc   :  { %586 = vst [vmem:[#allocation2 + $0x48] sm:$0xff] %v570_v50 }
 0x1dd   :  { %587 = vst [vmem:[#allocation2 + $0x40] sm:$0xff] %v571_v48 }
 0x1de   :  { %588 = vst [vmem:[#allocation2 + $0x20] sm:$0xff] %v572_v52 }
 0x1df   :  { %589 = vst [vmem:[#allocation2 + $0x10] sm:$0xff] %v573_v54 }
 0x1e0   :  { %590 = vst [vmem:[#allocation2 + $0x38] sm:$0xff] %v574_v58 }
 0x1e1   :  { %591 = vst [vmem:[#allocation2 + $0x60] sm:$0xff] %v575_v62 }
 0x1e2   :  { %592 = vst [vmem:[#allocation2 + $0x70] sm:$0xff] %v576_v35 }
 0x1e3   :  { %593 = vst [vmem:[#allocation2 + $0x78] sm:$0xff] %v577_v2 }
 0x1e4   :  { %594 = vst [vmem:[#allocation2 + $0x28] sm:$0xff] %v578_v3 }
 0x1e5 PF:  { %v1004_v30 = vld [vmem:[%s1349_s6 + $0x38] sm:$0xff]  ;;  %v1003_v33 = vld [vmem:[%s1349_s6 + $0x30] sm:$0xff]  ;;  %v1002_v34 = vld [vmem:[%s1349_s6 + $0x28] sm:$0xff] }
 0x1e6   :  { %726 = vmatpush.bf16.msra.mxu0 %v1004_v30  ;;  %1068 = vmatpush.bf16.msra.mxu1 %v1004_v30  ;;  %v1001_v4 = vld [vmem:[%s1349_s6 + $0x20] sm:$0xff]  ;;  %v1000_v5 = vld [vmem:[%s1349_s6 + $0x18] sm:$0xff]  ;;  %v999_v7 = vld [vmem:[%s1349_s6 + $0x10] sm:$0xff] }
 0x1e7   :  { %1069 = vmatpush.bf16.msra.mxu2 %v1004_v30  ;;  %1070 = vmatpush.bf16.msra.mxu3 %v1004_v30  ;;  %v1291_v6 = vld [vmem:[%s1348_s5] ss:$0 sm:$0xff]  ;;  %v598_v8 = vld [vmem:[#allocation2 + $0x30] sm:$0xff]  ;;  %v603_v11 = vld [vmem:[#allocation2 + $0x68] sm:$0xff] }
 0x1e8   :  { %v599_v9 = vld [vmem:[#allocation2] sm:$0xff]  ;;  %v602_v10 = vld [vmem:[#allocation2 + $0x50] sm:$0xff]  ;;  %v618_v16 = vadd.f32 %v1291_v6, %v598_v8  ;;  %v623_v19 = vadd.f32 %v1291_v6, %v603_v11  ;;  %v998_v21 = vld [vmem:[%s1349_s6 + $0x8] sm:$0xff] }
 0x1e9   :  { %v606_v12 = vld [vmem:[#allocation2 + $0x40] sm:$0xff]  ;;  %v611_v15 = vld [vmem:[#allocation2 + $0x70] sm:$0xff]  ;;  %v619_v17 = vadd.f32 %v1291_v6, %v599_v9  ;;  %v622_v18 = vadd.f32 %v1291_v6, %v602_v10  ;;  %v600_v60 = vld [vmem:[#allocation2 + $0x58] sm:$0xff] }
 0x1ea   :  { %727 = vmatpush.bf16.msra.mxu0 %v1003_v33  ;;  %1071 = vmatpush.bf16.msra.mxu1 %v1003_v33  ;;  %v607_v13 = vld [vmem:[#allocation2 + $0x20] sm:$0xff]  ;;  %v626_v20 = vadd.f32 %v1291_v6, %v606_v12  ;;  %v631_v24 = vadd.f32 %v1291_v6, %v611_v15  ;;  %v634_v25 = vmax.f32 %v618_v16, 0.0  ;;  %v639_v28 = vmax.f32 %v623_v19, 0.0  ;;  %v601_v40 = vld [vmem:[#allocation2 + $0x18] sm:$0xff]  ;;  %v604_v55 = vld [vmem:[#allocation2 + $0x8] sm:$0xff] }
 0x1eb   :  { %1072 = vmatpush.bf16.msra.mxu2 %v1003_v33  ;;  %1073 = vmatpush.bf16.msra.mxu3 %v1003_v33  ;;  %v610_v14 = vld [vmem:[#allocation2 + $0x60] sm:$0xff]  ;;  %v627_v22 = vadd.f32 %v1291_v6, %v607_v13  ;;  %v635_v26 = vmax.f32 %v619_v17, 0.0  ;;  %v638_v27 = vmax.f32 %v622_v18, 0.0  ;;  %v605_v56 = vld [vmem:[#allocation2 + $0x48] sm:$0xff]  ;;  %v608_v42 = vld [vmem:[#allocation2 + $0x10] sm:$0xff]  ;;  %v620_v47 = vadd.f32 %v1291_v6, %v600_v60 }
 0x1ec   :  { %v630_v23 = vadd.f32 %v1291_v6, %v610_v14  ;;  %v997_v29 = vld [vmem:[%s1349_s6] sm:$0xff]  ;;  %v642_v31 = vmax.f32 %v626_v20, 0.0  ;;  %v647_v36 = vmax.f32 %v631_v24, 0.0  ;;  %v609_v44 = vld [vmem:[#allocation2 + $0x38] sm:$0xff]  ;;  %v613_v50 = vld [vmem:[#allocation2 + $0x28] sm:$0xff]  ;;  %v621_v51 = vadd.f32 %v1291_v6, %v601_v40 }
 0x1ed   :  { %v643_v32 = vmax.f32 %v627_v22, 0.0  ;;  %v650_v37 = vpack.c.bf16 %v635_v26, %v634_v25  ;;  %v652_v1 = vpack.c.bf16 %v639_v28, %v638_v27  ;;  %v612_v45 = vld [vmem:[#allocation2 + $0x78] sm:$0xff]  ;;  %v624_v48 = vadd.f32 %v1291_v6, %v604_v55 }
 0x1ee   :  { %728 = vmatpush.bf16.msra.mxu0 %v1002_v34  ;;  %1074 = vmatpush.bf16.msra.mxu1 %v1002_v34  ;;  %v646_v0 = vmax.f32 %v630_v23, 0.0  ;;  %v625_v49 = vadd.f32 %v1291_v6, %v605_v56  ;;  %v628_v46 = vadd.f32 %v1291_v6, %v608_v42  ;;  %v629_v52 = vadd.f32 %v1291_v6, %v609_v44 }
 0x1ef   :  { %1075 = vmatpush.bf16.msra.mxu2 %v1002_v34  ;;  %1076 = vmatpush.bf16.msra.mxu3 %v1002_v34  ;;  %v654_v59 = vpack.c.bf16 %v643_v32, %v642_v31  ;;  %v632_v53 = vadd.f32 %v1291_v6, %v612_v45  ;;  %v633_v43 = vadd.f32 %v1291_v6, %v613_v50  ;;  %v636_v54 = vmax.f32 %v620_v47, 0.0 }
 0x1f0   :  { %v656_v39 = vpack.c.bf16 %v647_v36, %v646_v0  ;;  %v637_v57 = vmax.f32 %v621_v51, 0.0  ;;  %v640_v41 = vmax.f32 %v624_v48, 0.0  ;;  %v641_v58 = vmax.f32 %v625_v49, 0.0 }
 0x1f1   :  { %v644_v61 = vmax.f32 %v628_v46, 0.0  ;;  %v645_v38 = vmax.f32 %v629_v52, 0.0  ;;  %v648_v62 = vmax.f32 %v632_v53, 0.0  ;;  %v649_v63 = vmax.f32 %v633_v43, 0.0 }
 0x1f2   :  { %729 = vmatpush.bf16.msra.mxu0 %v1001_v4  ;;  %1077 = vmatpush.bf16.msra.mxu1 %v1001_v4  ;;  %v651_v35 = vpack.c.bf16 %v637_v57, %v636_v54  ;;  %v653_v2 = vpack.c.bf16 %v641_v58, %v640_v41 }
 0x1f3   :  { %1078 = vmatpush.bf16.msra.mxu2 %v1001_v4  ;;  %1079 = vmatpush.bf16.msra.mxu3 %v1001_v4  ;;  %v655_v3 = vpack.c.bf16 %v645_v38, %v644_v61  ;;  %v657_v30 = vpack.c.bf16 %v649_v63, %v648_v62  ;;  %v1094_v4 = vld [vmem:[%s1350_s7] ss:$0 sm:$0xff] }
 0x1f6   :  { %730 = vmatpush.bf16.msra.mxu0 %v1000_v5  ;;  %1080 = vmatpush.bf16.msra.mxu1 %v1000_v5 }
 0x1f7   :  { %1081 = vmatpush.bf16.msra.mxu2 %v1000_v5  ;;  %1082 = vmatpush.bf16.msra.mxu3 %v1000_v5 }
 0x1fa   :  { %731 = vmatpush.bf16.msra.mxu0 %v999_v7  ;;  %1083 = vmatpush.bf16.msra.mxu1 %v999_v7 }
 0x1fb   :  { %1084 = vmatpush.bf16.msra.mxu2 %v999_v7  ;;  %1085 = vmatpush.bf16.msra.mxu3 %v999_v7 }
 0x1fe   :  { %732 = vmatpush.bf16.msra.mxu0 %v998_v21  ;;  %1086 = vmatpush.bf16.msra.mxu1 %v998_v21 }
 0x1ff   :  { %1087 = vmatpush.bf16.msra.mxu2 %v998_v21  ;;  %1088 = vmatpush.bf16.msra.mxu3 %v998_v21 }
 0x202   :  { %733 = vmatpush.bf16.msra.mxu0 %v997_v29  ;;  %1089 = vmatpush.bf16.msra.mxu1 %v997_v29 }
 0x203   :  { %1090 = vmatpush.bf16.msra.mxu2 %v997_v29  ;;  %1091 = vmatpush.bf16.msra.mxu3 %v997_v29 }
 0x205   :  { %734 = vmatmul.bf16.vlgmr.msra.gmra.mxu0 %v650_v37  ;;  %744 = vmatmul.bf16.vlgmr.msra.gmra.mxu1 %v652_v1 }
 0x206   :  { %754 = vmatmul.bf16.vlgmr.msra.gmra.mxu2 %v654_v59  ;;  %764 = vmatmul.bf16.vlgmr.msra.gmra.mxu3 %v656_v39 }
 0x215   :  { %739 = vmatmul.bf16.gmra.mxu0 %v651_v35  ;;  %749 = vmatmul.bf16.gmra.mxu1 %v653_v2 }
 0x216   :  { %759 = vmatmul.bf16.gmra.mxu2 %v655_v3  ;;  %769 = vmatmul.bf16.gmra.mxu3 %v657_v30 }
 0x282   :  { %v735_v33 = vpop.f32.mrf.mxu0  ;;  %v745_v34 = vpop.f32.mrf.mxu1 }
 0x283   :  { %v736_v5 = vadd.f32 %v1094_v4, %v735_v33  ;;  %v746_v6 = vadd.f32 %v1094_v4, %v745_v34 }
 0x285   :  { %v775_v13 = vmax.f32 %v736_v5, 0.0  ;;  %v779_v14 = vmax.f32 %v746_v6, 0.0 }
 0x289   :  { %v755_v7 = vpop.f32.mrf.mxu2  ;;  %v765_v8 = vpop.f32.mrf.mxu3 }
 0x28a   :  { %v737_v9 = vpop.f32.mrf.mxu0  ;;  %v747_v10 = vpop.f32.mrf.mxu1  ;;  %v756_v19 = vadd.f32 %v1094_v4, %v755_v7  ;;  %v766_v20 = vadd.f32 %v1094_v4, %v765_v8 }
 0x28b   :  { %v738_v11 = vadd.f32 %v1094_v4, %v737_v9  ;;  %v748_v12 = vadd.f32 %v1094_v4, %v747_v10 }
 0x28c   :  { %v783_v27 = vmax.f32 %v756_v19, 0.0  ;;  %v787_v28 = vmax.f32 %v766_v20, 0.0 }
 0x28d   :  { %v776_v15 = vmax.f32 %v738_v11, 0.0  ;;  %v780_v16 = vmax.f32 %v748_v12, 0.0 }
 0x28f   :  { %v1008_v17 = vpack.c.bf16 %v776_v15, %v775_v13  ;;  %v1018_v18 = vpack.c.bf16 %v780_v16, %v779_v14 }
 0x291   :  { %1009 = vst [vmem:[%s1351_s8] sm:$0xff] %v1008_v17   ;;  %v757_v21 = vpop.f32.mrf.mxu2  ;;  %v767_v22 = vpop.f32.mrf.mxu3 }
 0x292   :  { %1046 = vst [vmem:[%s1351_s8 + $0x10] sm:$0xff] %v1018_v18   ;;  %v758_v23 = vadd.f32 %v1094_v4, %v757_v21  ;;  %v768_v24 = vadd.f32 %v1094_v4, %v767_v22  ;;  %v740_v25 = vpop.f32.mrf.mxu0  ;;  %v750_v26 = vpop.f32.mrf.mxu1 }
 0x293   :  { %v741_v36 = vadd.f32 %v1094_v4, %v740_v25  ;;  %v751_v37 = vadd.f32 %v1094_v4, %v750_v26 }
 0x294   :  { %v784_v29 = vmax.f32 %v758_v23, 0.0  ;;  %v788_v31 = vmax.f32 %v768_v24, 0.0 }
 0x295   :  { %v777_v56 = vmax.f32 %v741_v36, 0.0  ;;  %v781_v42 = vmax.f32 %v751_v37, 0.0 }
 0x296   :  { %v1028_v32 = vpack.c.bf16 %v784_v29, %v783_v27  ;;  %v1038_v0 = vpack.c.bf16 %v788_v31, %v787_v28 }
 0x298   :  { %1048 = vst [vmem:[%s1351_s8 + $0x20] sm:$0xff] %v1028_v32  }
 0x299   :  { %1050 = vst [vmem:[%s1351_s8 + $0x30] sm:$0xff] %v1038_v0   ;;  %v760_v1 = vpop.f32.mrf.mxu2  ;;  %v770_v59 = vpop.f32.mrf.mxu3 }
 0x29a   :  { %v742_v39 = vpop.f32.mrf.mxu0  ;;  %v752_v60 = vpop.f32.mrf.mxu1  ;;  %v761_v51 = vadd.f32 %v1094_v4, %v760_v1  ;;  %v771_v48 = vadd.f32 %v1094_v4, %v770_v59 }
 0x29b   :  { %v743_v40 = vadd.f32 %v1094_v4, %v742_v39  ;;  %v753_v55 = vadd.f32 %v1094_v4, %v752_v60 }
 0x29c   :  { %v785_v43 = vmax.f32 %v761_v51, 0.0  ;;  %v789_v54 = vmax.f32 %v771_v48, 0.0 }
 0x29d   :  { %v778_v44 = vmax.f32 %v743_v40, 0.0  ;;  %v782_v45 = vmax.f32 %v753_v55, 0.0 }
 0x29f   :  { %v1013_v50 = vpack.c.bf16 %v778_v44, %v777_v56  ;;  %v1023_v47 = vpack.c.bf16 %v782_v45, %v781_v42 }
 0x2a1   :  { %1045 = vst [vmem:[%s1351_s8 + $0x8] sm:$0xff] %v1013_v50   ;;  %v762_v49 = vpop.f32.mrf.mxu2  ;;  %v772_v46 = vpop.f32.mrf.mxu3 }
 0x2a2   :  { %1047 = vst [vmem:[%s1351_s8 + $0x18] sm:$0xff] %v1023_v47   ;;  %v763_v52 = vadd.f32 %v1094_v4, %v762_v49  ;;  %v773_v53 = vadd.f32 %v1094_v4, %v772_v46 }
 0x2a4   :  { %v786_v57 = vmax.f32 %v763_v52, 0.0  ;;  %v790_v41 = vmax.f32 %v773_v53, 0.0 }
 0x2a6   :  { %v1033_v58 = vpack.c.bf16 %v786_v57, %v785_v43  ;;  %v1043_v61 = vpack.c.bf16 %v790_v41, %v789_v54 }
 0x2a8   :  { %1049 = vst [vmem:[%s1351_s8 + $0x28] sm:$0xff] %v1033_v58  }
 0x2a9   :  { %1051 = vst [vmem:[%s1351_s8 + $0x38] sm:$0xff] %v1043_v61  }

</bundles_post_ra>
